<compile_context>
chip_gen: v7x
topology: tpu7x:2x2x1
jax: 0.10.0
libtpu: 0.0.40
codegen_flags: <defaults>
</compile_context>

<pallas_src>
import math

import jax
import jax.numpy as jnp
from jax.experimental import pallas as pl
from jax.experimental.pallas import tpu as pltpu


def _ceil_to(x, m):
    return ((x + m - 1) // m) * m


def make_inv_freq(dimension, t_min=0.01, t_max=1.0):
    """Deterministic parameter init matching the PyTorch __init__."""
    half = dimension // 2
    quarter = dimension // 4
    inv_freq = jnp.zeros((half,), dtype=jnp.float32)
    k = jnp.arange(0, half, 2, dtype=jnp.float32)          # length = dimension // 4
    vals = 2.0 * jnp.pi / (t_min * (t_max / t_min) ** (k / half))
    inv_freq = inv_freq.at[:quarter].set(vals)
    return inv_freq


def _rotary_ref(timestamps, inv_freq, out_dtype=jnp.float32):
    """Plain-JAX reference / small-input fast path (same math as the PyTorch fwd)."""
    freqs = timestamps.astype(jnp.float32)[..., None] * inv_freq.astype(jnp.float32)
    return jnp.repeat(freqs, 2, axis=-1).astype(out_dtype)


def _rotary_kernel(ts_ref, sel_ref, invf_ref, out_ref):
    # ts_ref:   (TM, G) f32 -- G adjacent timestamps per packed output row
    # sel_ref:  (G, W)  f32 -- 0/1 block-diagonal selector (resident in VMEM)
    # invf_ref: (1, W)  f32 -- interleave-repeated inv_freq tiled G times (resident)
    # out_ref:  (TM, W)     -- lane-dense packed frequencies
    ts = ts_ref[...]
    if ts.shape[-1] == 1:
        # G == 1 (dim is a multiple of 128): pure VPU broadcast-multiply below.
        rep = ts
    else:
        # Selector entries are exactly 0/1, so the HIGHEST multi-pass f32
        # decomposition reproduces each timestamp exactly; this matmul only
        # replicates a timestamp across its dim lanes (MXU has huge slack in
        # this mem-bound kernel).
        rep = jnp.dot(
            ts, sel_ref[...],
            preferred_element_type=jnp.float32,
            precision=jax.lax.Precision.HIGHEST,
        )
    # True f32 multiply on the VPU -> bit-exact vs the reference timestamps*inv_freq.
    out_ref[...] = (rep * invf_ref[...]).astype(out_ref.dtype)


def rotary_embedding(timestamps, inv_freq, *, out_dtype=jnp.float32,
                     min_pallas_out_bytes=1 << 20):
    """timestamps: (...,) float; inv_freq: (dim//2,) float; returns (..., dim)."""
    orig_shape = timestamps.shape
    ts = timestamps.astype(jnp.float32)
    inv_freq = inv_freq.astype(jnp.float32)
    dim = 2 * inv_freq.shape[0]

    N = 1
    for s in orig_shape:
        N *= s
    out_itemsize = jnp.dtype(out_dtype).itemsize

    # Small-input fast path: kernel launch + DMA setup would dominate.
    if N == 0 or N * dim * out_itemsize < min_pallas_out_bytes:
        return _rotary_ref(ts, inv_freq, out_dtype).reshape(*orig_shape, dim)

    # Fold the interleaved repeat ('... n -> ... (n r)', r=2) into the parameter.
    invf_rep = jnp.repeat(inv_freq, 2)                                  # (dim,)

    # Lane packing: W = lcm(dim, 128) is a multiple of 128 for any even dim.
    G = 128 // math.gcd(dim, 128)
    W = G * dim

    ts_flat = ts.reshape(-1)
    N_g = _ceil_to(N, G)
    if N_g != N:
        ts_flat = jnp.pad(ts_flat, (0, N_g - N))     # tiny pad on the small input side
    R = N_g // G
    ts2d = ts_flat.reshape(R, G)

    # Resident parameters (DMA'd once; same block every grid step).
    selector = jnp.kron(jnp.eye(G, dtype=jnp.float32),
                        jnp.ones((1, dim), dtype=jnp.float32))          # (G, W) 0/1
    invf_tile = jnp.tile(invf_rep, G)[None, :]                          # (1, W)

    # Row tile: ~4 MiB output block.  Double-buffered (~8 MiB) + tiny inputs fit
    # the default scoped VMEM on v5e (16 MiB) as well as v6e/v7x (32 MiB).
    max_tm = max(8, ((4 << 20) // (W * out_itemsize)) // 8 * 8)
    if R <= max_tm:
        TM = R                       # single full-extent block (legal even if not %8)
    else:
        TM = max_tm                  # multiple of 8; ragged last block is masked
    grid = (pl.cdiv(R, TM),)

    cost = pl.CostEstimate(
        flops=2 * R * G * W,
        transcendentals=0,
        bytes_accessed=R * G * 4 + G * W * 4 + W * 4 + R * W * out_itemsize,
    )

    out_packed = pl.pallas_call(
        _rotary_kernel,
        out_shape=jax.ShapeDtypeStruct((R, W), out_dtype),
        grid=grid,
        in_specs=[
            pl.BlockSpec((TM, G), lambda i: (i, 0)),
            pl.BlockSpec((G, W), lambda i: (0, 0)),    # resident selector
            pl.BlockSpec((1, W), lambda i: (0, 0)),    # resident inv_freq tile
        ],
        out_specs=pl.BlockSpec((TM, W), lambda i: (i, 0)),
        compiler_params=pltpu.CompilerParams(
            dimension_semantics=("parallel",)),
        cost_estimate=cost,
    )(ts2d, selector, invf_tile)

    # (R, W) -> (N_g, dim) is a free row-major reshape; slice only if we padded.
    out = out_packed.reshape(N_g, dim)
    if N_g != N:
        out = out[:N]
    return out.reshape(*orig_shape, dim)


if __name__ == "__main__":
    dimension = 32
    B, S = 2, 8

    key = jax.random.PRNGKey(0)
    timestamps = jax.random.uniform(key, (B, S), dtype=jnp.float32)
    inv_freq = make_inv_freq(dimension, t_min=0.01, t_max=1.0)

    # Force the Pallas path even at this small demo size so the kernel runs.
    out = rotary_embedding(timestamps, inv_freq, min_pallas_out_bytes=0)
    out = jax.block_until_ready(out)

    ref = _rotary_ref(timestamps, inv_freq)
    assert out.shape == (B, S, dimension), out.shape
    assert jnp.allclose(out, ref, rtol=1e-6, atol=1e-6), "mismatch vs reference"

    # Extra coverage: token count not a multiple of the packing factor G (pad path).
    ts2 = jax.random.uniform(jax.random.PRNGKey(1), (2, 7), dtype=jnp.float32)
    out2 = jax.block_until_ready(
        rotary_embedding(ts2, inv_freq, min_pallas_out_bytes=0))
    assert out2.shape == (2, 7, dimension)
    assert jnp.allclose(out2, _rotary_ref(ts2, inv_freq), rtol=1e-6, atol=1e-6)

    # Small-input XLA fast path (default threshold).
    out3 = jax.block_until_ready(rotary_embedding(timestamps, inv_freq))
    assert jnp.allclose(out3, ref, rtol=1e-6, atol=1e-6)

    print("KERNEL_OK")
</pallas_src>

<mosaic_0001>
module attributes {stable_mosaic.version = 11 : i64} {
  func.func @_rotary_kernel(%arg0: i32, %arg1: memref<4x4xf32, #tpu.memory_space<vmem>>, %arg2: memref<4x128xf32, #tpu.memory_space<vmem>>, %arg3: memref<1x128xf32, #tpu.memory_space<vmem>>, %arg4: memref<4x128xf32, #tpu.memory_space<vmem>>) attributes {dimension_semantics = [#tpu.dimension_semantics<parallel>], iteration_bounds = array<i64: 1>, scalar_prefetch = 0 : i64, scratch_operands = 0 : i64, tpu.core_type = #tpu.core_type<tc>, window_params = [{transform_indices = @transform_0, window_bounds = array<i64: 4, 4>}, {pipeline_mode = #tpu.pipeline_mode<synchronous>, transform_indices = @transform_1, window_bounds = array<i64: 4, 128>}, {pipeline_mode = #tpu.pipeline_mode<synchronous>, transform_indices = @transform_2, window_bounds = array<i64: 1, 128>}, {transform_indices = @transform_3, window_bounds = array<i64: 4, 128>}]} {
    %c0 = arith.constant 0 : index
    %c0_0 = arith.constant 0 : index
    %0 = vector.load %arg1[%c0, %c0_0] : memref<4x4xf32, #tpu.memory_space<vmem>>, vector<4x4xf32>
    %c0_1 = arith.constant 0 : index
    %c0_2 = arith.constant 0 : index
    %1 = vector.load %arg2[%c0_1, %c0_2] : memref<4x128xf32, #tpu.memory_space<vmem>>, vector<4x128xf32>
    %cst = arith.constant dense<0.000000e+00> : vector<4x128xf32>
    %2 = tpu.matmul %0, %1, %cst {dimension_numbers = #tpu.dot_dimension_numbers<[1], [0], [0], [1], [0, 0, 1, 1], [], []>, precision = #tpu.contract_precision<fp32>} : vector<4x4xf32>, vector<4x128xf32>, vector<4x128xf32> -> vector<4x128xf32>
    %c0_3 = arith.constant 0 : index
    %c0_4 = arith.constant 0 : index
    %3 = vector.load %arg3[%c0_3, %c0_4] : memref<1x128xf32, #tpu.memory_space<vmem>>, vector<1x128xf32>
    %4 = vector.broadcast %3 : vector<1x128xf32> to vector<4x128xf32>
    %5 = arith.mulf %2, %4 : vector<4x128xf32>
    %c0_5 = arith.constant 0 : index
    %c0_6 = arith.constant 0 : index
    %6 = vector.load %arg4[%c0_5, %c0_6] : memref<4x128xf32, #tpu.memory_space<vmem>>, vector<4x128xf32>
    tpu.vector_store %arg4[%c0_5, %c0_6], %5 {strides = array<i32>} : memref<4x128xf32, #tpu.memory_space<vmem>>, vector<4x128xf32>,
    return
  }
  func.func @transform_0(%arg0: i32) -> (i32, i32) {
    %c0_i32 = arith.constant 0 : i32
    %c0_i32_0 = arith.constant 0 : i32
    return %arg0, %c0_i32 : i32, i32
  }
  func.func @transform_1(%arg0: i32) -> (i32, i32) {
    %c0_i32 = arith.constant 0 : i32
    %c0_i32_0 = arith.constant 0 : i32
    %c0_i32_1 = arith.constant 0 : i32
    return %c0_i32, %c0_i32_0 : i32, i32
  }
  func.func @transform_2(%arg0: i32) -> (i32, i32) {
    %c0_i32 = arith.constant 0 : i32
    %c0_i32_0 = arith.constant 0 : i32
    %c0_i32_1 = arith.constant 0 : i32
    return %c0_i32, %c0_i32_0 : i32, i32
  }
  func.func @transform_3(%arg0: i32) -> (i32, i32) {
    %c0_i32 = arith.constant 0 : i32
    %c0_i32_0 = arith.constant 0 : i32
    return %arg0, %c0_i32 : i32, i32
  }
}

</mosaic_0001>

<bundles_post_ra>
// kernel: tpu_custom_call.1
= control target key start
LH: loop header
LB: loop body
LE: loop exit
PB: predicated region body
PF: predicated region fallthrough
CT: control target
= control target key end

     0   :  { %8 = vsyncpa [#allocation3], 0  ;;  %s719_s0 = inlined_call_operand.hbm [shape: f32[4,4], index: 0, kind: input, shape index: {}]   ;;  %s720_s1 = inlined_call_operand.hbm [shape: f32[4,128], index: 1, kind: input, shape index: {}]   ;;  %s721_s2 = inlined_call_operand.vmem [shape: f32[1,128], index: 2, kind: input, shape index: {}]   ;;  %s722_s3 = inlined_call_operand.hbm [shape: f32[4,128], index: 3, kind: output, shape index: {}]  }
   0x1   :  { %9 = vsyncpa [#allocation6], 0 }
   0x2   :  { %10 = vsyncpa [#allocation4], 0  ;;  %s649_s12 = smov [#allocation2]   ;;  %s650_s14 = smov [#allocation5]  }
   0x3   :  { %s17_s13 = sshll.u32 %s649_s12, 4  ;;  %s27_s15 = sshll.u32 %s650_s14, 4  ;;  %s18_s13 = int_to_ptr.vmem [resolvable:$true] %s17_s13  ;;  %s28_s15 = int_to_ptr.vmem [resolvable:$true] %s27_s15 }
   0x4   :  { %s577_s18 = scalar_lea.hbm %s719_s0, 64 }
   0x5   :  { %p578_p0 = scmp.ne.s32.totalorder %s719_s0, %s577_s18  ;;  %p581_p1 = scmp.lt.u32.totalorder %s577_s18, %s719_s0 }
   0x7   :  { %p583_p2 = pnand %p581_p1, %p578_p0 }
   0x9   :  { %586 = shalt.err (!%p583_p2)
}
   0xa   :  { %s587_s23 = scalar_lea.vmem %s18_s13, 64  ;;  %p592_p4 = scmp.lt.s32.totalorder %s18_s13, %s18_s13 }
   0xb   :  { %p588_p3 = scmp.ne.s32.totalorder %s18_s13, %s587_s23  ;;  %p593_p5 = scmp.lt.s32.totalorder %s587_s23, %s587_s23 }
   0xd   :  { %p594_p6 = por %p593_p5, %p592_p4 }
   0xf   :  { %p595_p7 = pnand %p594_p6, %p588_p3 }
  0x11   :  { %598 = shalt.err (!%p595_p7)
}
  0x12   :  { %20 = dma.hbm_to_vmem [thread:$0]  %s719_s0, 64, %s18_s13, [#allocation3]  }
  0x13   :  { %s599_s28 = scalar_lea.hbm %s720_s1, 64 }
  0x14   :  { %p600_p8 = scmp.ne.s32.totalorder %s720_s1, %s599_s28  ;;  %p603_p9 = scmp.lt.u32.totalorder %s599_s28, %s720_s1 }
  0x16   :  { %p605_p10 = pnand %p603_p9, %p600_p8 }
  0x18   :  { %608 = shalt.err (!%p605_p10)
}
  0x19   :  { %s609_s6 = scalar_lea.vmem %s28_s15, 64  ;;  %p614_p12 = scmp.lt.s32.totalorder %s28_s15, %s28_s15 }
  0x1a   :  { %p610_p11 = scmp.ne.s32.totalorder %s28_s15, %s609_s6  ;;  %p615_p13 = scmp.lt.s32.totalorder %s609_s6, %s609_s6 }
  0x1c   :  { %p616_p0 = por %p615_p13, %p614_p12 }
  0x1e   :  { %p617_p1 = pnand %p616_p0, %p610_p11 }
  0x20   :  { %620 = shalt.err (!%p617_p1)
}
  0x21   :  { %30 = dma.hbm_to_vmem [thread:$0]  %s720_s1, 64, %s28_s15, [#allocation6]  }
  0x22   :  { %643 = dma.done.wait [#allocation3], 64  }
  0x23   :  { %644 = vsyncadd [#allocation3], 4294967232 }
  0x24   :  { %645 = dma.done.wait [#allocation6], 64  }
  0x25   :  { %646 = vsyncadd [#allocation6], 4294967232  ;;  %v651_v0 = vmov 0.0   ;;  %vm652_vm0 = vmmov 0   ;;  %vm45_vm1 = vcmask 1043456   ;;  %vm41_vm2 = vcmask 31744  }
  0x26   :  { %548 = vmatprep.subr.mxu0 %v651_v0  ;;  %550 = vmatprep.mubr.msk.f32.mxu0 %vm652_vm0, %v651_v0  ;;  %v40_v1 = vld [vmem:[#allocation5] sm:$0xf]  ;;  %v39_v2 = vld [vmem:[#allocation2] sm:$0xf]  ;;  %s653_s9 = smov [#allocation7]  }
  0x27   :  { %533 = vmatprep.subr.mxu1 %v651_v0  ;;  %535 = vmatprep.mubr.msk.f32.mxu1 %vm652_vm0, %v651_v0  ;;  %v47_v3 = vsel %vm45_vm1, %v40_v1, 0  ;;  %v43_v4 = vsel %vm41_vm2, %v39_v2, 0  ;;  %v520_v18 = vld [vmem:[%s721_s2] ss:$0 sm:$0xff]  ;;  %s510_s10 = sshll.u32 %s653_s9, 4  ;;  %s511_s10 = int_to_ptr.vmem [resolvable:$true] %s510_s10 }
  0x28   :  { %v50_v5 = vand.u32 4294901760, %v47_v3  ;;  %v115_v6 = vand.u32 4294901760, %v43_v4  ;;  %s621_s11 = scalar_lea.vmem %s511_s10, 64  ;;  %p626_p3 = scmp.lt.s32.totalorder %s511_s10, %s511_s10 }
  0x29   :  { %p622_p2 = scmp.ne.s32.totalorder %s511_s10, %s621_s11  ;;  %p627_p4 = scmp.lt.s32.totalorder %s621_s11, %s621_s11 }
  0x2a   :  { %v127_v7 = vsub.f32 %v47_v3, %v50_v5  ;;  %549 = vmatpush3.msra.mxu0 %v50_v5  ;;  %v116_v8 = vsub.f32 %v43_v4, %v115_v6  ;;  %534 = vmatpush3.msra.mxu1 %v50_v5 }
  0x2b   :  { %538 = vmatprep.subr.mxu1 %v651_v0  ;;  %553 = vmatprep.subr.mxu0 %v651_v0  ;;  %p628_p5 = por %p627_p4, %p626_p3 }
  0x2c   :  { %v117_v9 = vand.u32 4294901760, %v116_v8  ;;  %v128_v10 = vand.u32 4294901760, %v127_v7 }
  0x2d   :  { %p629_p6 = pnand %p628_p5, %p622_p2 }
  0x2e   :  { %551 = vmatmul.mubr.f32.vlgmr.msra.gmra.mrb[0].mxu0 %v117_v9  ;;  %v118_v11 = vsub.f32 %v116_v8, %v117_v9  ;;  %v129_v12 = vsub.f32 %v127_v7, %v128_v10 }
  0x2f   :  { %554 = vmatpush3.msra.mxu0 %v128_v10  ;;  %555 = vmatprep.mubr.msk.f32.mxu0 %vm652_vm0, %v651_v0 }
  0x30   :  { %v119_v13 = vand.u32 4294901760, %v118_v11  ;;  %v130_v14 = vand.u32 4294901760, %v129_v12  ;;  %558 = vmatprep.subr.mxu0 %v651_v0 }
  0x32   :  { %536 = vmatmul.mubr.f32.vlgmr.msra.gmra.mrb[0].mxu1 %v119_v13 }
  0x33   :  { %539 = vmatpush3.msra.mxu1 %v130_v14  ;;  %540 = vmatprep.mubr.msk.f32.mxu1 %vm652_vm0, %v651_v0 }
  0x34   :  { %543 = vmatprep.subr.mxu1 %v651_v0 }
  0x36   :  { %556 = vmatmul.mubr.f32.vlgmr.msra.gmra.mrb[0].mxu0 %v115_v6 }
  0x37   :  { %559 = vmatpush3.msra.mxu0 %v50_v5  ;;  %560 = vmatprep.mubr.msk.f32.mxu0 %vm652_vm0, %v651_v0 }
  0x3a   :  { %541 = vmatmul.mubr.f32.vlgmr.msra.gmra.mrb[0].mxu1 %v115_v6 }
  0x3b   :  { %544 = vmatpush3.msra.mxu1 %v127_v7  ;;  %545 = vmatprep.mubr.msk.f32.mxu1 %vm652_vm0, %v651_v0 }
  0x3e   :  { %561 = vmatmul.mubr.f32.vlgmr.msra.gmra.mrb[0].mxu0 %v115_v6 }
  0x42   :  { %546 = vmatmul.mubr.f32.vlgmr.msra.gmra.mrb[0].mxu1 %v116_v8 }
 0x111   :  { %v491_v15 = vpop.f32.mrb[0].mxu0 }
 0x112   :  { %v562_v16 = vpop.f32.mrb[1].mxu0 }
 0x115   :  { %v271_v17 = vpop.f32.mrb[0].mxu1 }
 0x116   :  { %v563_v19 = vadd.f32 %v491_v15, %v271_v17  ;;  %v547_v20 = vpop.f32.mrb[1].mxu1 }
 0x118   :  { %v502_v21 = vmul.f32 %v563_v19, %v520_v18 }
 0x11a   :  { %503 = vst [vmem:[#allocation7] sm:$0xf] %v502_v21 }
 0x11b   :  { %632 = shalt.err (!%p629_p6)
}
 0x11c   :  { %s633_s14 = scalar_lea.hbm %s722_s3, 64 }
 0x11d   :  { %p634_p7 = scmp.ne.s32.totalorder %s722_s3, %s633_s14  ;;  %p637_p8 = scmp.lt.u32.totalorder %s633_s14, %s722_s3 }
 0x11f   :  { %p639_p9 = pnand %p637_p8, %p634_p7 }
 0x121   :  { %642 = shalt.err (!%p639_p9)
}
 0x122   :  { %513 = dma.vmem_to_hbm [thread:$0]  %s511_s10, 64, %s722_s3, [#allocation4]  }
 0x123   :  { %647 = dma.done.wait [#allocation4], 64  }
 0x124   :  { %648 = vsyncadd [#allocation4], 4294967232 }
 0x125   :  { %517 = vsyncpa [#allocation3], 1 }
 0x126   :  { %518 = vsyncpa [#allocation6], 1 }
 0x127   :  { %519 = vsyncpa [#allocation4], 1 }

</bundles_post_ra>
